<compile_context>
chip_gen: v6e
topology: v6e:2x2x1
jax: 0.10.0
libtpu: 0.0.40
codegen_flags: <defaults>
</compile_context>

<pallas_src>
import functools

import jax
import jax.numpy as jnp
from jax import lax
from jax.experimental import pallas as pl
from jax.experimental.pallas import tpu as pltpu


# ----------------------------------------------------------------------------
# Plain-JAX glue: sampling & grouping
# ----------------------------------------------------------------------------
def index_points(points, idx):
    """points: [B, N, D], idx: [B, ...] int -> [B, ..., D]"""
    B = points.shape[0]
    batch = jnp.arange(B).reshape((B,) + (1,) * (idx.ndim - 1))
    return points[batch, idx]


def square_distance(src, dst):
    dist = -2.0 * jnp.einsum("bnc,bmc->bnm", src, dst)
    dist = dist + jnp.sum(src**2, -1)[:, :, None]
    dist = dist + jnp.sum(dst**2, -1)[:, None, :]
    return dist


def farthest_point_sim_sample(xyz, npoint, points, key):
    """Cosine-similarity FPS (lax.scan, not an unrolled Python loop)."""
    B, N, _ = xyz.shape
    eps = 1e-8
    pts_norm = jnp.maximum(jnp.linalg.norm(points, axis=-1), eps)       # [B, N]
    distance0 = jnp.full((B, N), 1e10, dtype=jnp.float32)
    farthest0 = jax.random.randint(key, (B,), 0, N, dtype=jnp.int32)
    batch_idx = jnp.arange(B)

    def step(carry, _):
        distance, farthest = carry
        cfeat = points[batch_idx, farthest, :]                          # [B, D]
        c_norm = jnp.maximum(jnp.linalg.norm(cfeat, axis=-1), eps)
        cos = jnp.einsum("bd,bnd->bn", cfeat, points) / (
            c_norm[:, None] * pts_norm)
        distance = jnp.minimum(distance, 1.0 - cos)
        nxt = jnp.argmax(distance, axis=-1).astype(jnp.int32)
        return (distance, nxt), farthest

    _, cents = lax.scan(step, (distance0, farthest0), None, length=npoint)
    return jnp.transpose(cents)                                         # [B, npoint]


def query_ball_point(radius, nsample, xyz, new_xyz):
    """xyz: [B, N, 3], new_xyz: [B, S, 3] -> group_idx [B, S, nsample] int32.
    NOTE: if a query point had zero neighbors within `radius` the index would
    stay == N and the JAX gather clamps to N-1 (differs from PyTorch OOB).
    Here new_xyz is always a subset of xyz, so self-distance 0 guarantees at
    least one valid neighbor."""
    B, N, _ = xyz.shape
    S = new_xyz.shape[1]
    sqrdists = square_distance(new_xyz, xyz)                            # [B, S, N]
    group_idx = jnp.broadcast_to(jnp.arange(N, dtype=jnp.int32), (B, S, N))
    group_idx = jnp.where(sqrdists > radius**2, N, group_idx)
    group_idx = jnp.sort(group_idx, axis=-1)[:, :, :nsample]
    group_first = group_idx[:, :, 0:1]
    group_idx = jnp.where(group_idx == N, group_first, group_idx)
    return group_idx


def sample_and_group(npoint, radius, nsample, xyz, points, knn, fps_idx):
    """Returns new_xyz [B,S,3] (f32) and grouped features in K-MAJOR layout
    [B, K, S, 3+D] ALREADY in bf16 (cast before the gather so the K-expanded
    tensor is materialized exactly once in HBM)."""
    new_xyz = index_points(xyz, fps_idx)                                # [B, S, 3] f32
    if knn:
        dists = square_distance(new_xyz, xyz)
        idx = jnp.argsort(dists, axis=-1)[:, :, :nsample]
    else:
        idx = query_ball_point(radius, nsample, xyz, new_xyz)           # [B, S, K]
    idx_km = jnp.transpose(idx, (0, 2, 1))                              # [B, K, S] (tiny)
    # TODO(synk): structural option — fuse this gather into the kernel via
    # PrefetchScalarGridSpec scalar-prefetched indices + manual DMA, so the
    # [B,K,S,C0] tensor never hits HBM.
    grouped_xyz = index_points(xyz.astype(jnp.bfloat16), idx_km)        # [B,K,S,3]
    grouped_xyz_norm = grouped_xyz - new_xyz.astype(jnp.bfloat16)[:, None, :, :]
    if points is not None:
        grouped_points = index_points(points.astype(jnp.bfloat16), idx_km)
        new_points = jnp.concatenate([grouped_xyz_norm, grouped_points], axis=-1)
    else:
        new_points = grouped_xyz_norm
    return new_xyz, new_points                                          # f32, bf16


def sample_and_group_all(xyz, points):
    """group_all variant: returns new_xyz [B,1,3] f32 and the flat (un-grouped)
    feature tensor [B, N, 3+D] in bf16."""
    B, N, C = xyz.shape
    new_xyz = jnp.zeros((B, 1, C), dtype=xyz.dtype)
    gx = xyz.astype(jnp.bfloat16)
    if points is not None:
        new_points = jnp.concatenate([gx, points.astype(jnp.bfloat16)], axis=-1)
    else:
        new_points = gx
    return new_xyz, new_points


# ----------------------------------------------------------------------------
# Pallas kernel: (1x1 conv + folded BN + ReLU) stack on kT*tS rows, max over K
# ----------------------------------------------------------------------------
def _round_up(x, m):
    return ((x + m - 1) // m) * m


def _device_vmem_budget():
    """(block working-set budget, vmem_limit cap) per TPU generation."""
    kind = ""
    try:
        kind = jax.devices()[0].device_kind.lower()
    except Exception:
        pass
    if "v7" in kind:                       # 64 MiB physical VMEM, 2 TCs
        return 40 * 2**20, 56 * 2**20
    return 80 * 2**20, 104 * 2**20         # v5e / v6e: 128 MiB physical


def _vmem_per_step(kT, tS, c0, layer_io):
    """Estimated VMEM working set of one grid step, accounting for lane
    padding (last dim lives in 128-wide lanes) and f32 intermediates."""
    lane = lambda c: _round_up(max(c, 1), 128)
    sub = lambda c: _round_up(max(c, 1), 8)
    R = kT * tS
    in_block = kT * sub(tS) * lane(c0) * 2                    # bf16 input block
    wsum = 0
    for cin, cout in layer_io:
        wsum += sub(cin) * lane(cout) * 2 + 8 * lane(cout) * 4
    inter = 0
    prev = lane(c0)
    for cin, cout in layer_io:
        inter = max(inter, R * (prev * 2 + lane(cout) * 4))   # bf16 in + f32 out
        prev = lane(cout)
    out_block = sub(tS) * lane(layer_io[-1][1]) * 4
    return 2 * in_block + 2 * wsum + int(1.5 * inter) + 2 * out_block + (2 << 20)


def _choose_tiles(S, K, c0, layer_io, budget, max_rows=8192):
    """Pick (kT, tS): prefer folding the whole K, then the largest S tile
    (multiple of 8) that keeps the working set within the VMEM budget."""
    S8 = max(8, _round_up(S, 8))
    cands = [t for t in (1024, 512, 256, 128, 64, 32, 16, 8) if t <= S8]
    kT = K
    for tS in cands:
        if kT * tS <= max_rows and _vmem_per_step(kT, tS, c0, layer_io) <= budget:
            return kT, tS
    tS = cands[-1]
    kT = K
    while kT > 1 and (kT * tS > max_rows
                      or _vmem_per_step(kT, tS, c0, layer_io) > budget):
        kT = (kT + 1) // 2
    return kT, tS


def _mlp_max_kernel(num_layers, kT, tS, *refs):
    # refs = (x_ref, w0, b0, w1, b1, ..., o_ref)
    x_ref = refs[0]
    o_ref = refs[1 + 2 * num_layers]
    k = pl.program_id(2)

    c0 = x_ref.shape[-1]
    h_in = x_ref[...].reshape(kT * tS, c0)                # (kT*tS, C0) bf16
    h = None
    for i in range(num_layers):
        w = refs[1 + 2 * i][...]                          # (Cin, Cout_pad) bf16
        b = refs[2 + 2 * i][...]                          # (1, Cout_pad) f32
        h = jnp.maximum(
            jnp.dot(h_in, w, preferred_element_type=jnp.float32) + b, 0.0)
        if i + 1 < num_layers:                            # no repack after last
            h_in = h.astype(jnp.bfloat16)
    c_out = h.shape[-1]
    part = jnp.max(h.reshape(kT, tS, c_out), axis=0)      # max over kT (VPU)

    # o_ref's block index is constant over k -> VMEM-resident accumulator.
    @pl.when(k == 0)
    def _():
        o_ref[...] = part

    @pl.when(k > 0)
    def _():
        o_ref[...] = jnp.maximum(o_ref[...], part)


def mlp_and_max(grouped_kmajor, weights, biases, out_channels):
    """grouped_kmajor: [B, K, S, C0] (bf16, K-major).
    weights[i]: [Cin, Cout_pad] bf16 (BN folded, zero padded),
    biases[i]:  [1, Cout_pad] f32.
    Returns [B, S, out_channels] f32 = max over K of the per-point MLP."""
    B, K, S, C0 = (int(d) for d in grouped_kmajor.shape)
    num_layers = len(weights)
    c_last_pad = int(weights[-1].shape[1])
    layer_io = [(int(w.shape[0]), int(w.shape[1])) for w in weights]

    x = grouped_kmajor.astype(jnp.bfloat16)
    budget, vmem_cap = _device_vmem_budget()
    kT, tS = _choose_tiles(S, K, C0, layer_io, budget)
    # v7x has 2 TensorCores: keep at least 2 parallel (b, s) tiles if we can.
    if B * (_round_up(S, tS) // tS) < 2 and tS >= 16:
        tS //= 2
    S_pad = _round_up(S, tS)
    K_pad = _round_up(K, kT)
    if S_pad != S:       # pad rows are independent per-s garbage; sliced off
        x = jnp.pad(x, ((0, 0), (0, 0), (0, S_pad - S), (0, 0)))
    if K_pad != K:       # pad neighbor slabs with copies of k=0 (max-neutral)
        reps = jnp.broadcast_to(x[:, :1], (B, K_pad - K, S_pad, C0))
        x = jnp.concatenate([x, reps], axis=1)

    kernel = functools.partial(_mlp_max_kernel, num_layers, kT, tS)

    in_specs = [pl.BlockSpec((None, kT, tS, C0), lambda b, s, k: (b, k, s, 0))]
    for w, bb in zip(weights, biases):
        # TODO(synk): pipeline_mode=pl.Buffered(1) would single-buffer these
        # constant blocks (small VMEM saving, only material on v7x).
        in_specs.append(pl.BlockSpec(w.shape, lambda b, s, k: (0, 0)))
        in_specs.append(pl.BlockSpec(bb.shape, lambda b, s, k: (0, 0)))
    out_specs = pl.BlockSpec((None, tS, c_last_pad), lambda b, s, k: (b, s, 0))

    flops = 2 * B * K_pad * S_pad * sum(ci * co for ci, co in layer_io)
    bytes_accessed = (int(x.size) * 2
                      + sum(int(w.size) * 2 for w in weights)
                      + sum(int(bb.size) * 4 for bb in biases)
                      + B * S_pad * c_last_pad * 4)
    cost = pl.CostEstimate(flops=int(flops), transcendentals=0,
                           bytes_accessed=int(bytes_accessed))

    per_step = _vmem_per_step(kT, tS, C0, layer_io)
    vmem_limit = int(min(vmem_cap, max(32 * 2**20, 2 * per_step)))

    out = pl.pallas_call(
        kernel,
        out_shape=jax.ShapeDtypeStruct((B, S_pad, c_last_pad), jnp.float32),
        grid_spec=pltpu.PrefetchScalarGridSpec(
            num_scalar_prefetch=0,
            grid=(B, S_pad // tS, K_pad // kT),
            in_specs=in_specs,
            out_specs=out_specs),
        compiler_params=pltpu.CompilerParams(
            dimension_semantics=("parallel", "parallel", "arbitrary"),
            vmem_limit_bytes=vmem_limit),
        cost_estimate=cost,
    )(x, *[t for pair in zip(weights, biases) for t in pair])
    return out[:, :S, :out_channels]


# ----------------------------------------------------------------------------
# Module wrapper
# ----------------------------------------------------------------------------
class PointNetSetAbstractionAttenJAX:
    def __init__(self, npoint, radius, nsample, in_channel, mlp, group_all,
                 knn=False, key=None):
        self.npoint = npoint
        self.radius = radius
        self.nsample = nsample
        self.knn = knn
        self.group_all = group_all
        self.out_channels = int(mlp[-1])
        key = jax.random.PRNGKey(0) if key is None else key

        # Conv2d(1x1) + eval-mode BatchNorm2d (running stats) folded into one
        # affine per layer.  Output channels are zero-padded to multiples of
        # 128 (lane-dense matmuls / stores); the first layer's INPUT width
        # stays at in_channel (padding C0 up to 128 only inflates HBM/VMEM).
        # TODO(synk): norm='wsconv' / norm='group' variants and training-mode
        # (batch-statistics) BatchNorm are not implemented.
        self.weights = []   # [Cin(_pad), Cout_pad] bf16
        self.biases = []    # [1, Cout_pad] f32
        eps = 1e-5
        last_c, last_c_pad = in_channel, in_channel
        for out_c in mlp:
            out_c_pad = _round_up(out_c, 128)
            key, k_w, k_b, k_g, k_be, k_m, k_v = jax.random.split(key, 7)
            std = (2.0 / (last_c + out_c)) ** 0.5
            w = std * jax.random.normal(k_w, (out_c, last_c), jnp.float32)
            conv_b = 0.01 * jax.random.normal(k_b, (out_c,), jnp.float32)
            gamma = 1.0 + 0.1 * jax.random.normal(k_g, (out_c,), jnp.float32)
            beta = 0.1 * jax.random.normal(k_be, (out_c,), jnp.float32)
            r_mean = 0.1 * jax.random.normal(k_m, (out_c,), jnp.float32)
            r_var = 1.0 + jnp.abs(
                0.1 * jax.random.normal(k_v, (out_c,), jnp.float32))
            scale = gamma / jnp.sqrt(r_var + eps)
            w_eff = (w * scale[:, None]).T                    # [C_in, C_out]
            b_eff = (conv_b - r_mean) * scale + beta          # [C_out]
            w_pad = jnp.zeros((last_c_pad, out_c_pad), jnp.float32)
            w_pad = w_pad.at[:last_c, :out_c].set(w_eff)
            b_pad = jnp.zeros((1, out_c_pad), jnp.float32)
            b_pad = b_pad.at[0, :out_c].set(b_eff)
            # (If VALU-bound: fold b_eff of layer 0 into W0 via a ones column.)
            self.weights.append(w_pad.astype(jnp.bfloat16))
            self.biases.append(b_pad)
            last_c, last_c_pad = out_c, out_c_pad

    def __call__(self, xyz, points, key):
        """xyz: [B, N, 3], points: [B, N, D] ->
        (new_xyz [B, S, 3], new_points [B, S, mlp[-1]])  (channel-last, like
        the PyTorch module's .transpose(1, 2) output)."""
        if self.group_all:
            new_xyz, flat = sample_and_group_all(xyz, points)   # [B,N,C0] bf16
            B, Np, C0 = flat.shape
            n_pad = _round_up(Np, 8)
            if n_pad != Np:          # pad with copies of row 0 (max-neutral)
                reps = jnp.broadcast_to(flat[:, :1, :], (B, n_pad - Np, C0))
                flat = jnp.concatenate([flat, reps], axis=1)
            grouped = flat.reshape(B, n_pad // 8, 8, C0)        # K-major view
            feats8 = mlp_and_max(grouped, self.weights, self.biases,
                                 self.out_channels)             # [B, 8, C']
            feats = jnp.max(feats8, axis=1, keepdims=True)      # [B, 1, C']
            return new_xyz, feats
        fps_idx = farthest_point_sim_sample(xyz, self.npoint, points, key)
        new_xyz, grouped = sample_and_group(
            self.npoint, self.radius, self.nsample, xyz, points,
            knn=self.knn, fps_idx=fps_idx)                      # [B,K,S,C0] bf16
        feats = mlp_and_max(grouped, self.weights, self.biases,
                            self.out_channels)
        return new_xyz, feats


# ----------------------------------------------------------------------------
if __name__ == "__main__":
    B, N, D = 2, 64, 4            # batch, points, extra feature channels
    npoint, nsample, radius = 16, 8, 0.4
    in_channel = 3 + D            # grouped = [xyz_norm(3) | point feats(D)]
    mlp = [16, 32]

    root = jax.random.PRNGKey(0)
    k_xyz, k_pts, k_fps, k_p1, k_p2 = jax.random.split(root, 5)
    xyz = jax.random.uniform(k_xyz, (B, N, 3), jnp.float32)
    points = jax.random.normal(k_pts, (B, N, D), jnp.float32)

    # ------------------ regular (ball-query grouping) path ------------------
    module = PointNetSetAbstractionAttenJAX(
        npoint, radius, nsample, in_channel, mlp, group_all=False,
        knn=False, key=k_p1)
    fwd = jax.jit(module.__call__)
    new_xyz, feats = fwd(xyz, points, k_fps)
    new_xyz, feats = jax.block_until_ready((new_xyz, feats))

    # Pure-JAX reference of the in-kernel compute path (same bf16 matmul
    # inputs, f32 accumulation / bias / ReLU / max over K).
    fps_idx = farthest_point_sim_sample(xyz, npoint, points, k_fps)
    _, grouped = sample_and_group(npoint, radius, nsample, xyz, points,
                                  knn=False, fps_idx=fps_idx)   # [B,K,S,C0] bf16
    h_in = grouped
    for w, bb in zip(module.weights, module.biases):
        h = jnp.maximum(
            jnp.einsum("bksc,cd->bksd", h_in, w,
                       preferred_element_type=jnp.float32) + bb, 0.0)
        h_in = h.astype(jnp.bfloat16)
    ref = h.max(axis=1)[:, :, :mlp[-1]]

    assert new_xyz.shape == (B, npoint, 3)
    assert feats.shape == (B, npoint, mlp[-1])
    err = float(jnp.max(jnp.abs(feats - ref)))
    assert jnp.allclose(feats, ref, atol=1e-2, rtol=1e-2), err

    # ----------------------------- group_all path ---------------------------
    module_all = PointNetSetAbstractionAttenJAX(
        None, None, None, in_channel, mlp, group_all=True, key=k_p2)
    new_xyz_all, feats_all = jax.jit(module_all.__call__)(xyz, points, k_fps)
    feats_all = jax.block_until_ready(feats_all)

    ga = jnp.concatenate([xyz, points], axis=-1).astype(jnp.bfloat16)
    h_in = ga
    for w, bb in zip(module_all.weights, module_all.biases):
        h = jnp.maximum(
            jnp.einsum("bnc,cd->bnd", h_in, w,
                       preferred_element_type=jnp.float32) + bb, 0.0)
        h_in = h.astype(jnp.bfloat16)
    ref_all = h.max(axis=1, keepdims=True)[:, :, :mlp[-1]]

    assert new_xyz_all.shape == (B, 1, 3)
    assert feats_all.shape == (B, 1, mlp[-1])
    err_all = float(jnp.max(jnp.abs(feats_all - ref_all)))
    assert jnp.allclose(feats_all, ref_all, atol=1e-2, rtol=1e-2), err_all

    print("KERNEL_OK")
</pallas_src>

<mosaic_0001>
module attributes {stable_mosaic.version = 11 : i64} {
  func.func @_mlp_max_kernel(%arg0: i32, %arg1: i32, %arg2: i32, %arg3: memref<1x8x16x7xbf16, #tpu.memory_space<vmem>>, %arg4: memref<7x128xbf16, #tpu.memory_space<vmem>>, %arg5: memref<1x128xf32, #tpu.memory_space<vmem>>, %arg6: memref<128x128xbf16, #tpu.memory_space<vmem>>, %arg7: memref<1x128xf32, #tpu.memory_space<vmem>>, %arg8: memref<1x16x128xf32, #tpu.memory_space<vmem>>) attributes {dimension_semantics = [#tpu.dimension_semantics<parallel>, #tpu.dimension_semantics<parallel>, #tpu.dimension_semantics<arbitrary>], iteration_bounds = array<i64: 2, 1, 1>, scalar_prefetch = 0 : i64, scratch_operands = 0 : i64, tpu.core_type = #tpu.core_type<tc>, window_params = [{transform_indices = @transform_0, window_bounds = array<i64: 1, 8, 16, 7>}, {pipeline_mode = #tpu.pipeline_mode<synchronous>, transform_indices = @transform_1, window_bounds = array<i64: 7, 128>}, {pipeline_mode = #tpu.pipeline_mode<synchronous>, transform_indices = @transform_2, window_bounds = array<i64: 1, 128>}, {pipeline_mode = #tpu.pipeline_mode<synchronous>, transform_indices = @transform_3, window_bounds = array<i64: 128, 128>}, {pipeline_mode = #tpu.pipeline_mode<synchronous>, transform_indices = @transform_4, window_bounds = array<i64: 1, 128>}, {transform_indices = @transform_5, window_bounds = array<i64: 1, 16, 128>}]} {
    %c0 = arith.constant 0 : index
    %c0_0 = arith.constant 0 : index
    %c0_1 = arith.constant 0 : index
    %c0_2 = arith.constant 0 : index
    %0 = vector.load %arg3[%c0, %c0_0, %c0_1, %c0_2] : memref<1x8x16x7xbf16, #tpu.memory_space<vmem>>, vector<1x8x16x7xbf16>
    %1 = vector.shape_cast %0 : vector<1x8x16x7xbf16> to vector<8x16x7xbf16>
    %2 = vector.shape_cast %1 : vector<8x16x7xbf16> to vector<128x7xbf16>
    %c0_3 = arith.constant 0 : index
    %c0_4 = arith.constant 0 : index
    %3 = vector.load %arg4[%c0_3, %c0_4] : memref<7x128xbf16, #tpu.memory_space<vmem>>, vector<7x128xbf16>
    %c0_5 = arith.constant 0 : index
    %c0_6 = arith.constant 0 : index
    %4 = vector.load %arg5[%c0_5, %c0_6] : memref<1x128xf32, #tpu.memory_space<vmem>>, vector<1x128xf32>
    %cst = arith.constant dense<0.000000e+00> : vector<128x128xf32>
    %5 = tpu.matmul %2, %3, %cst {dimension_numbers = #tpu.dot_dimension_numbers<[1], [0], [0], [1], [0, 0, 1, 1], [], []>} : vector<128x7xbf16>, vector<7x128xbf16>, vector<128x128xf32> -> vector<128x128xf32>
    %6 = vector.broadcast %4 : vector<1x128xf32> to vector<128x128xf32>
    %7 = arith.addf %5, %6 : vector<128x128xf32>
    %cst_7 = arith.constant 0.000000e+00 : f32
    %8 = vector.broadcast %cst_7 : f32 to vector<128x128xf32>
    %9 = arith.maximumf %7, %8 : vector<128x128xf32>
    %10 = arith.truncf %9 : vector<128x128xf32> to vector<128x128xbf16>
    %c0_8 = arith.constant 0 : index
    %c0_9 = arith.constant 0 : index
    %11 = vector.load %arg6[%c0_8, %c0_9] : memref<128x128xbf16, #tpu.memory_space<vmem>>, vector<128x128xbf16>
    %c0_10 = arith.constant 0 : index
    %c0_11 = arith.constant 0 : index
    %12 = vector.load %arg7[%c0_10, %c0_11] : memref<1x128xf32, #tpu.memory_space<vmem>>, vector<1x128xf32>
    %cst_12 = arith.constant dense<0.000000e+00> : vector<128x128xf32>
    %13 = tpu.matmul %10, %11, %cst_12 {dimension_numbers = #tpu.dot_dimension_numbers<[1], [0], [0], [1], [0, 0, 1, 1], [], []>} : vector<128x128xbf16>, vector<128x128xbf16>, vector<128x128xf32> -> vector<128x128xf32>
    %14 = vector.broadcast %12 : vector<1x128xf32> to vector<128x128xf32>
    %15 = arith.addf %13, %14 : vector<128x128xf32>
    %cst_13 = arith.constant 0.000000e+00 : f32
    %16 = vector.broadcast %cst_13 : f32 to vector<128x128xf32>
    %17 = arith.maximumf %15, %16 : vector<128x128xf32>
    %18 = vector.shape_cast %17 : vector<128x128xf32> to vector<8x16x128xf32>
    %cst_14 = arith.constant dense<0xFF800000> : vector<16x128xf32>
    %19 = vector.multi_reduction <maximumf>, %18, %cst_14 [0] : vector<8x16x128xf32> to vector<16x128xf32>
    %c0_i32 = arith.constant 0 : i32
    %20 = arith.cmpi eq, %arg2, %c0_i32 : i32
    %21 = arith.extui %20 : i1 to i32
    %c0_i32_15 = arith.constant 0 : i32
    %22 = arith.cmpi ne, %21, %c0_i32_15 : i32
    scf.if %22 {
      %c0_18 = arith.constant 0 : index
      %c0_19 = arith.constant 0 : index
      %c0_20 = arith.constant 0 : index
      %26 = vector.load %arg8[%c0_18, %c0_19, %c0_20] : memref<1x16x128xf32, #tpu.memory_space<vmem>>, vector<1x16x128xf32>
      %27 = vector.shape_cast %26 : vector<1x16x128xf32> to vector<16x128xf32>
      %28 = vector.shape_cast %19 : vector<16x128xf32> to vector<1x16x128xf32>
      tpu.vector_store %arg8[%c0_18, %c0_19, %c0_20], %28 {strides = array<i32>} : memref<1x16x128xf32, #tpu.memory_space<vmem>>, vector<1x16x128xf32>,
    } else {
    }
    %c0_i32_16 = arith.constant 0 : i32
    %23 = arith.cmpi sgt, %arg2, %c0_i32_16 : i32
    %24 = arith.extui %23 : i1 to i32
    %c0_i32_17 = arith.constant 0 : i32
    %25 = arith.cmpi ne, %24, %c0_i32_17 : i32
    scf.if %25 {
      %c0_18 = arith.constant 0 : index
      %c0_19 = arith.constant 0 : index
      %c0_20 = arith.constant 0 : index
      %26 = vector.load %arg8[%c0_18, %c0_19, %c0_20] : memref<1x16x128xf32, #tpu.memory_space<vmem>>, vector<1x16x128xf32>
      %27 = vector.shape_cast %26 : vector<1x16x128xf32> to vector<16x128xf32>
      %28 = arith.maximumf %27, %19 : vector<16x128xf32>
      %c0_21 = arith.constant 0 : index
      %c0_22 = arith.constant 0 : index
      %c0_23 = arith.constant 0 : index
      %29 = vector.load %arg8[%c0_21, %c0_22, %c0_23] : memref<1x16x128xf32, #tpu.memory_space<vmem>>, vector<1x16x128xf32>
      %30 = vector.shape_cast %29 : vector<1x16x128xf32> to vector<16x128xf32>
      %31 = vector.shape_cast %28 : vector<16x128xf32> to vector<1x16x128xf32>
      tpu.vector_store %arg8[%c0_21, %c0_22, %c0_23], %31 {strides = array<i32>} : memref<1x16x128xf32, #tpu.memory_space<vmem>>, vector<1x16x128xf32>,
    } else {
    }
    return
  }
  func.func @transform_0(%arg0: i32, %arg1: i32, %arg2: i32) -> (i32, i32, i32, i32) {
    %c0_i32 = arith.constant 0 : i32
    %c0_i32_0 = arith.constant 0 : i32
    return %arg0, %arg2, %arg1, %c0_i32 : i32, i32, i32, i32
  }
  func.func @transform_1(%arg0: i32, %arg1: i32, %arg2: i32) -> (i32, i32) {
    %c0_i32 = arith.constant 0 : i32
    %c0_i32_0 = arith.constant 0 : i32
    %c0_i32_1 = arith.constant 0 : i32
    return %c0_i32, %c0_i32_0 : i32, i32
  }
  func.func @transform_2(%arg0: i32, %arg1: i32, %arg2: i32) -> (i32, i32) {
    %c0_i32 = arith.constant 0 : i32
    %c0_i32_0 = arith.constant 0 : i32
    %c0_i32_1 = arith.constant 0 : i32
    return %c0_i32, %c0_i32_0 : i32, i32
  }
  func.func @transform_3(%arg0: i32, %arg1: i32, %arg2: i32) -> (i32, i32) {
    %c0_i32 = arith.constant 0 : i32
    %c0_i32_0 = arith.constant 0 : i32
    %c0_i32_1 = arith.constant 0 : i32
    return %c0_i32, %c0_i32_0 : i32, i32
  }
  func.func @transform_4(%arg0: i32, %arg1: i32, %arg2: i32) -> (i32, i32) {
    %c0_i32 = arith.constant 0 : i32
    %c0_i32_0 = arith.constant 0 : i32
    %c0_i32_1 = arith.constant 0 : i32
    return %c0_i32, %c0_i32_0 : i32, i32
  }
  func.func @transform_5(%arg0: i32, %arg1: i32, %arg2: i32) -> (i32, i32, i32) {
    %c0_i32 = arith.constant 0 : i32
    %c0_i32_0 = arith.constant 0 : i32
    return %arg0, %arg1, %c0_i32 : i32, i32, i32
  }
}

</mosaic_0001>

<bundles_post_ra>
// kernel: custom-call.10
= control target key start
LH: loop header
LB: loop body
LE: loop exit
PB: predicated region body
PF: predicated region fallthrough
CT: control target
= control target key end

     0   :  { %s6_s0 = inlined_call_operand.vmem [shape: s32[16,2], index: 0, kind: output, shape index: {}]  }

// kernel: custom-call.8
= control target key start
LH: loop header
LB: loop body
LE: loop exit
PB: predicated region body
PF: predicated region fallthrough
CT: control target
= control target key end

     0   :  { %s6_s0 = inlined_call_operand.vmem [shape: f32[2,64], index: 0, kind: output, shape index: {}]  }

// kernel: a_call__.1
= control target key start
LH: loop header
LB: loop body
LE: loop exit
PB: predicated region body
PF: predicated region fallthrough
CT: control target
= control target key end

     0   :  { %10 = vsyncpa [#allocation3], 0  ;;  %s1303_s0 = inlined_call_operand.vmem [shape: bf16[2,8,16,7], index: 0, kind: input, shape index: {}]   ;;  %s1304_s1 = inlined_call_operand.vmem [shape: bf16[7,128], index: 1, kind: input, shape index: {}]   ;;  %s1305_s2 = inlined_call_operand.vmem [shape: f32[1,128], index: 2, kind: input, shape index: {}]   ;;  %s1306_s3 = inlined_call_operand.vmem [shape: bf16[128,128], index: 3, kind: input, shape index: {}]   ;;  %s1307_s4 = inlined_call_operand.vmem [shape: f32[1,128], index: 4, kind: input, shape index: {}]   ;;  %s1308_s5 = inlined_call_operand.hbm [shape: f32[2,16,128], index: 5, kind: output, shape index: {}]  }
   0x1   :  { %12 = vsyncpa [#allocation3 + $0x1], 0  ;;  %s1134_s18 = smov 0   ;;  %s1136_s19 = smov 0  }
   0x2   :  { %s1138_s20 = smov 0   ;;  %s1140_s21 = smov 0  }
   0x3   :  { %s1142_s22 = smov 0   ;;  %s1144_s23 = smov 0  }
   0x4 LB: > { %s816_s24 = sadd.s32 4294967295, %s1098_s23   ;;  %s817_s25 = sadd.s32 4294967294, %s1098_s23   ;;  %s1098_s23 = sphi %s1144_s23, %s18_s23   ;;  %s1094_s22 = sphi %s1142_s22, %s1315_s22   ;;  %s1090_s21 = sphi %s1140_s21, %s1314_s21   ;;  %s1086_s20 = sphi %s1138_s20, %s1313_s20   ;;  %s1082_s19 = sphi %s1136_s19, %s1312_s19   ;;  %s1078_s18 = sphi %s1134_s18, %s1311_s18  }
   0x5   : > { %s37_s26 = sadd.s32 1, %s1094_s22  ;;  %s160_s27 = sadd.s32 1, %s1086_s20 }
   0x6   : > { %p39_p0 = scmp.ge.s32.totalorder %s37_s26, 2  ;;  %p170_p1 = scmp.ne.s32.totalorder %s1086_s20, %s1082_s19 }
   0x7   : > { %p171_p2 = scmp.eq.s32.totalorder %s816_s24, 1  ;;  %p176_p3 = scmp.ne.s32.totalorder %s1082_s19, %s1078_s18 }
   0x8   : > { %s1317_s26 = smov (%p39_p0, %s37_s26), 0  ;;  %p177_p5 = scmp.eq.s32.totalorder %s817_s25, 1 }
   0x9   : > { %p1174_p4 = por %p171_p2, %p170_p1  ;;  %s155_s29 = ssub.s32 %s1094_s22, %s1317_s26 }
   0xa   : > { %p820_p6 = scmp.ge.s32.totalorder %s1098_s23, 1  ;;  %p158_p7 = scmp.eq.s32.totalorder %s155_s29, 0 }
   0xb   : > { %p1181_p8 = por %p177_p5, %p176_p3  ;;  %p226_p9 = scmp.lt.s32.totalorder %s1098_s23, 3 }
   0xc   : > { %s1187_s6 = scalar_select %p158_p7, %s1086_s20, %s160_s27  }
   0xd   : > { %p227_p10 = pnand %p820_p6, %p226_p9 }
   0xe   : > { %p265_p11 = scmp.lt.s32.totalorder (!%p227_p10), %s1090_s21, 1  ;;  %s260_s25 = sand.u32 (!%p227_p10), 1, %s1082_s19  }
   0xf   : > { %230 = sbr.rel (%p227_p10) target bundleno = 480 (0x1e0), region = 40  ;;  %s821_s27 = sshll.u32 (!%p227_p10), %s260_s25, 4 }
  0x10   : > { %s262_s29 = scalar_lea.vmem (!%p227_p10), [#allocation2], %s821_s27  ;;  %s856_s8 = sshll.u32 (!%p227_p10), %s1090_s21, 8 }
  0x11   : > { %s728_s7 = sshll.u32 (!%p227_p10), %s262_s29, 4  ;;  %s1252_s11 = scalar_lea.hbm (!%p227_p10), %s1308_s5, %s856_s8  ;;  %s1254_s7 = int_to_ptr.vmem [resolvable:$true] %s728_s7 }
  0x12   : > { %s1022_s13 = scalar_lea.vmem (!%p227_p10), %s1254_s7, 256 }
  0x13   : > { %p1023_p12 = scmp.ne.s32.totalorder (!%p227_p10), %s1254_s7, %s1022_s13 }
  0x14   : > { %v297_v0 = vld [vmem:[%s1304_s1] sm:$0xf]  ;;  %vm370_vm0 = vcmask 1042432   ;;  %vm371_vm1 = vcmask 1043456   ;;  %v1100_v1 = vmov 65535   ;;  %s266_s9 = scalar_select %p265_p11, %s1090_s21, 1 }
  0x15   : > { %v372_v2 = vsel %vm370_vm0, 4294967295, %v1100_v1  ;;  %v1014_v4 = vld [vmem:[%s1306_s3 + $0x38] sm:$0xff]   ;;  %v1015_v6 = vld [vmem:[%s1306_s3 + $0x30] sm:$0xff]   ;;  %vm345_vm2 = vcmask 56320   ;;  %v1016_v10 = vld [vmem:[%s1306_s3 + $0x28] sm:$0xff]   ;;  %p1024_p13 = pnand %p1023_p12, %p1174_p4  ;;  %s1101_s21 = smov [#allocation2]  }
  0x16   : > { %v373_v3 = vsel %vm371_vm1, %v372_v2, 0  ;;  %s855_s12 = sshll.u32 %s266_s9, 6  ;;  %932 = vmatprep.subr.bf16.mxu1 %v1014_v4  ;;  %v1017_v11 = vld [vmem:[%s1306_s3 + $0x20] sm:$0xff]   ;;  %v1018_v14 = vld [vmem:[%s1306_s3 + $0x18] sm:$0xff]   ;;  %v1019_v18 = vld [vmem:[%s1306_s3 + $0x10] sm:$0xff]   ;;  %s1026_s14 = sshll.u32 %s1101_s21, 4  ;;  %s1027_s14 = int_to_ptr.vmem [resolvable:$false] %s1026_s14 }
  0x17   : > { %v375_v5 = vand.u32 %v373_v3, %v297_v0  ;;  %s1203_s17 = scalar_lea.vmem %s1303_s0, %s855_s12  ;;  %940 = vmatpush3.bf16.msra.mxu1 %v1014_v4  ;;  %v1020_v19 = vld [vmem:[%s1306_s3 + $0x8] sm:$0xff]   ;;  %v1021_v20 = vld [vmem:[%s1306_s3] sm:$0xff]   ;;  %s1258_s12 = scalar_lea.sflag [#allocation3], %s260_s25 }
  0x18   : > { %v1006_v7 = vld [vmem:[%s1203_s17] sm:$0xff]   ;;  %933 = vmatprep.subr.bf16.mxu1 %v1015_v6  ;;  %v1007_v8 = vld [vmem:[%s1203_s17 + $0x8] sm:$0xff]   ;;  %v1008_v9 = vld [vmem:[%s1203_s17 + $0x10] sm:$0xff]   ;;  %p1025_p0 = pneg %p1024_p13  ;;  %s1028_s15 = scalar_lea.vmem %s1027_s14, 512 }
  0x19   : > { %882 = vmatprep.subr.bf16.mxu0 %v375_v5  ;;  %884 = vmatprep.mubr.msk.bf16.mxu0 %vm345_vm2, %v1006_v7  ;;  %v1009_v12 = vld [vmem:[%s1203_s17 + $0x18] sm:$0xff]   ;;  %v1010_v13 = vld [vmem:[%s1203_s17 + $0x20] sm:$0xff]   ;;  %v1011_v15 = vld [vmem:[%s1203_s17 + $0x28] sm:$0xff]   ;;  %p1029_p1 = scmp.lt.s32.totalorder %s1254_s7, %s1027_s14  ;;  %p1030_p2 = scmp.lt.s32.totalorder %s1028_s15, %s1022_s13 }
  0x1a   : > { %883 = vmatpush3.bf16.msra.mxu0 %v375_v5  ;;  %v1012_v16 = vld [vmem:[%s1203_s17 + $0x30] sm:$0xff]   ;;  %v1013_v17 = vld [vmem:[%s1203_s17 + $0x38] sm:$0xff]   ;;  %v824_v23 = vld [vmem:[%s1305_s2] ss:$0 sm:$0xff] }
  0x1b   : > { %900 = vmatprep.subr.bf16.mxu0 %v1014_v4  ;;  %941 = vmatpush3.bf16.msra.mxu1 %v1015_v6  ;;  %p1031_p3 = por %p1030_p2, %p1029_p1 }
  0x1c   : > { %934 = vmatprep.subr.bf16.mxu1 %v1016_v10 }
  0x1d   : > { %885 = vmatmul.mubr.msk.bf16.vlgmr.msra.gmra.mxu0 %vm345_vm2, %v1007_v8  ;;  %p1032_p5 = pnand %p1031_p3, %p1025_p0 }
  0x1e   : > { %888 = vmatprep.mubr.msk.bf16.mxu0 %vm345_vm2, %v1008_v9  ;;  %901 = vmatpush3.bf16.msra.mxu0 %v1014_v4 }
  0x1f   : > { %902 = vmatprep.subr.bf16.mxu0 %v1015_v6  ;;  %942 = vmatpush3.bf16.msra.mxu1 %v1016_v10 }
  0x20   : > { %935 = vmatprep.subr.bf16.mxu1 %v1017_v11 }
  0x22   : > { %903 = vmatpush3.bf16.msra.mxu0 %v1015_v6 }
  0x23   : > { %904 = vmatprep.subr.bf16.mxu0 %v1016_v10  ;;  %943 = vmatpush3.bf16.msra.mxu1 %v1017_v11 }
  0x24   : > { %936 = vmatprep.subr.bf16.mxu1 %v1018_v14 }
  0x25   : > { %889 = vmatmul.mubr.msk.bf16.gmra.mxu0 %vm345_vm2, %v1009_v12 }
  0x26   : > { %892 = vmatprep.mubr.msk.bf16.mxu0 %vm345_vm2, %v1010_v13  ;;  %905 = vmatpush3.bf16.msra.mxu0 %v1016_v10 }
  0x27   : > { %906 = vmatprep.subr.bf16.mxu0 %v1017_v11  ;;  %944 = vmatpush3.bf16.msra.mxu1 %v1018_v14 }
  0x28   : > { %937 = vmatprep.subr.bf16.mxu1 %v1019_v18 }
  0x2a   : > { %907 = vmatpush3.bf16.msra.mxu0 %v1017_v11 }
  0x2b   : > { %908 = vmatprep.subr.bf16.mxu0 %v1018_v14  ;;  %945 = vmatpush3.bf16.msra.mxu1 %v1019_v18 }
  0x2c   : > { %938 = vmatprep.subr.bf16.mxu1 %v1020_v19 }
  0x2d   : > { %893 = vmatmul.mubr.msk.bf16.gmra.mxu0 %vm345_vm2, %v1011_v15 }
  0x2e   : > { %896 = vmatprep.mubr.msk.bf16.mxu0 %vm345_vm2, %v1012_v16  ;;  %909 = vmatpush3.bf16.msra.mxu0 %v1018_v14 }
  0x2f   : > { %910 = vmatprep.subr.bf16.mxu0 %v1019_v18  ;;  %946 = vmatpush3.bf16.msra.mxu1 %v1020_v19 }
  0x30   : > { %939 = vmatprep.subr.bf16.mxu1 %v1021_v20 }
  0x32   : > { %911 = vmatpush3.bf16.msra.mxu0 %v1019_v18 }
  0x33   : > { %912 = vmatprep.subr.bf16.mxu0 %v1020_v19  ;;  %947 = vmatpush3.bf16.msra.mxu1 %v1021_v20 }
  0x35   : > { %897 = vmatmul.mubr.msk.bf16.gmra.mxu0 %vm345_vm2, %v1013_v17 }
  0x36   : > { %913 = vmatpush3.bf16.msra.mxu0 %v1020_v19 }
  0x37   : > { %914 = vmatprep.subr.bf16.mxu0 %v1021_v20 }
  0x3a   : > { %915 = vmatpush3.bf16.msra.mxu0 %v1021_v20  ;;  %v841_v20 = vld [vmem:[%s1307_s4] ss:$0 sm:$0xff] }
  0xdd   : > { %v886_v21 = vpop.f32.mrf.mxu0 }
  0xde   : > { %v420_v27 = vadd.f32 %v886_v21, %v824_v23 }
  0xdf   : > { %v411_v22 = vpop.f32.mrf.mxu0 }
  0xe0   : > { %v412_v25 = vadd.f32 %v824_v23, %v411_v22  ;;  %v476_v34 = vmax.f32 %v420_v27, 0.0 }
  0xe1   : > { %v887_v24 = vpop.f32.mrf.mxu0 }
  0xe2   : > { %v423_v26 = vadd.f32 %v887_v24, %v824_v23  ;;  %v474_v32 = vmax.f32 %v412_v25, 0.0 }
  0xe3   : > { %v414_v28 = vpop.f32.mrf.mxu0 }
  0xe4   : > { %v415_v29 = vadd.f32 %v824_v23, %v414_v28  ;;  %v477_v30 = vmax.f32 %v423_v26, 0.0 }
  0xe5   : > { %v890_v31 = vpop.f32.mrf.mxu0 }
  0xe6   : > { %v475_v33 = vmax.f32 %v415_v29, 0.0  ;;  %v491_v37 = vpack.c.bf16 %v477_v30, %v476_v34  ;;  %v436_v41 = vadd.f32 %v890_v31, %v824_v23 }
  0xe7   : > { %v427_v35 = vpop.f32.mrf.mxu0 }
  0xe8   : > { %v490_v36 = vpack.c.bf16 %v475_v33, %v474_v32  ;;  %v428_v39 = vadd.f32 %v824_v23, %v427_v35  ;;  %v480_v48 = vmax.f32 %v436_v41, 0.0 }
  0xe9   : > { %v891_v38 = vpop.f32.mrf.mxu0 }
  0xea   : > { %v439_v40 = vadd.f32 %v891_v38, %v824_v23  ;;  %916 = vmatprep.mubr.bf16.mxu0 %v490_v36  ;;  %v478_v46 = vmax.f32 %v428_v39, 0.0 }
  0xeb   : > { %v430_v42 = vpop.f32.mrf.mxu0  ;;  %917 = vmatmul.mubr.bf16.vlgmr.msra.gmra.mxu0 %v491_v37 }
  0xec   : > { %v431_v43 = vadd.f32 %v824_v23, %v430_v42  ;;  %v481_v44 = vmax.f32 %v439_v40, 0.0 }
  0xed   : > { %v894_v45 = vpop.f32.mrf.mxu0 }
  0xee   : > { %v479_v47 = vmax.f32 %v431_v43, 0.0  ;;  %v493_v51 = vpack.c.bf16 %v481_v44, %v480_v48  ;;  %v452_v55 = vadd.f32 %v894_v45, %v824_v23 }
  0xef   : > { %v443_v49 = vpop.f32.mrf.mxu0 }
  0xf0   : > { %v492_v50 = vpack.c.bf16 %v479_v47, %v478_v46  ;;  %v444_v53 = vadd.f32 %v824_v23, %v443_v49  ;;  %v484_v62 = vmax.f32 %v452_v55, 0.0 }
  0xf1   : > { %v895_v52 = vpop.f32.mrf.mxu0 }
  0xf2   : > { %v455_v54 = vadd.f32 %v895_v52, %v824_v23  ;;  %920 = vmatprep.mubr.bf16.mxu1 %v492_v50  ;;  %v482_v60 = vmax.f32 %v444_v53, 0.0 }
  0xf3   : > { %v446_v56 = vpop.f32.mrf.mxu0  ;;  %921 = vmatmul.mubr.bf16.vlgmr.msra.gmra.mxu1 %v493_v51 }
  0xf4   : > { %v447_v57 = vadd.f32 %v824_v23, %v446_v56  ;;  %v485_v58 = vmax.f32 %v455_v54, 0.0 }
  0xf5   : > { %v898_v59 = vpop.f32.mrf.mxu0 }
  0xf6   : > { %v483_v61 = vmax.f32 %v447_v57, 0.0  ;;  %v495_v1 = vpack.c.bf16 %v485_v58, %v484_v62  ;;  %v468_v5 = vadd.f32 %v898_v59, %v824_v23 }
  0xf7   : > { %v459_v63 = vpop.f32.mrf.mxu0 }
  0xf8   : > { %v494_v0 = vpack.c.bf16 %v483_v61, %v482_v60  ;;  %v460_v3 = vadd.f32 %v824_v23, %v459_v63  ;;  %v488_v11 = vmax.f32 %v468_v5, 0.0 }
  0xf9   : > { %v899_v2 = vpop.f32.mrf.mxu0 }
  0xfa   : > { %v471_v4 = vadd.f32 %v899_v2, %v824_v23  ;;  %924 = vmatprep.mubr.bf16.mxu1 %v494_v0  ;;  %v486_v9 = vmax.f32 %v460_v3, 0.0 }
  0xfb   : > { %v462_v6 = vpop.f32.mrf.mxu0  ;;  %925 = vmatmul.mubr.bf16.gmra.mxu1 %v495_v1 }
  0xfc   : > { %v463_v7 = vadd.f32 %v824_v23, %v462_v6  ;;  %v489_v8 = vmax.f32 %v471_v4, 0.0 }
  0xfe   : > { %v487_v10 = vmax.f32 %v463_v7, 0.0  ;;  %v497_v13 = vpack.c.bf16 %v489_v8, %v488_v11 }
 0x100   : > { %v496_v12 = vpack.c.bf16 %v487_v10, %v486_v9 }
 0x102   : > { %928 = vmatprep.mubr.bf16.mxu1 %v496_v12 }
 0x103   : > { %929 = vmatmul.mubr.bf16.gmra.mxu1 %v497_v13 }
 0x1ab   : > { %v918_v15 = vpop.f32.mrf.mxu0 }
 0x1ac   : > { %v612_v26 = vadd.f32 %v918_v15, %v841_v20 }
 0x1ad   : > { %v603_v18 = vpop.f32.mrf.mxu0 }
 0x1ae   : > { %v604_v27 = vadd.f32 %v841_v20, %v603_v18  ;;  %v668_v37 = vmax.f32 %v612_v26, 0.0 }
 0x1af   : > { %v919_v22 = vpop.f32.mrf.mxu0 }
 0x1b0   : > { %v666_v38 = vmax.f32 %v604_v27, 0.0  ;;  %v615_v39 = vadd.f32 %v919_v22, %v841_v20 }
 0x1b1   : > { %v606_v31 = vpop.f32.mrf.mxu0 }
 0x1b2   : > { %v607_v40 = vadd.f32 %v841_v20, %v606_v31  ;;  %v669_v54 = vmax.f32 %v615_v39, 0.0 }
 0x1b3   : > { %v922_v14 = vpop.f32.mrf.mxu1 }
 0x1b4   : > { %v628_v23 = vadd.f32 %v922_v14, %v841_v20  ;;  %v667_v55 = vmax.f32 %v607_v40, 0.0 }
 0x1b5   : > { %v619_v16 = vpop.f32.mrf.mxu1 }
 0x1b6   : > { %v620_v24 = vadd.f32 %v841_v20, %v619_v16  ;;  %v672_v32 = vmax.f32 %v628_v23, 0.0 }
 0x1b7   : > { %v923_v17 = vpop.f32.mrf.mxu1 }
 0x1b8   : > { %v670_v33 = vmax.f32 %v620_v24, 0.0  ;;  %v631_v34 = vadd.f32 %v923_v17, %v841_v20  ;;  %v683_v47 = vmax.f32 %v668_v37, %v672_v32 }
 0x1b9   : > { %v622_v19 = vpop.f32.mrf.mxu1 }
 0x1ba   : > { %v623_v35 = vadd.f32 %v841_v20, %v622_v19  ;;  %v682_v48 = vmax.f32 %v666_v38, %v670_v33  ;;  %v673_v49 = vmax.f32 %v631_v34, 0.0 }
 0x1bb   : > { %v926_v21 = vpop.f32.mrf.mxu1 }
 0x1bc   : > { %v644_v28 = vadd.f32 %v926_v21, %v841_v20  ;;  %v671_v50 = vmax.f32 %v623_v35, 0.0  ;;  %v690_v63 = vmax.f32 %v669_v54, %v673_v49 }
 0x1bd   : > { %v635_v25 = vpop.f32.mrf.mxu1 }
 0x1be   : > { %v636_v29 = vadd.f32 %v841_v20, %v635_v25  ;;  %v676_v41 = vmax.f32 %v644_v28, 0.0  ;;  %v689_v0 = vmax.f32 %v667_v55, %v671_v50 }
 0x1bf   : > { %v927_v30 = vpop.f32.mrf.mxu1 }
 0x1c0   : > { %v674_v42 = vmax.f32 %v636_v29, 0.0  ;;  %v647_v44 = vadd.f32 %v927_v30, %v841_v20  ;;  %v685_v56 = vmax.f32 %v683_v47, %v676_v41 }
 0x1c1   : > { %v638_v36 = vpop.f32.mrf.mxu1 }
 0x1c2   : > { %v639_v45 = vadd.f32 %v841_v20, %v638_v36  ;;  %v684_v57 = vmax.f32 %v682_v48, %v674_v42  ;;  %v677_v59 = vmax.f32 %v647_v44, 0.0 }
 0x1c3   : > { %v930_v43 = vpop.f32.mrf.mxu1 }
 0x1c4   : > { %v660_v46 = vadd.f32 %v930_v43, %v841_v20  ;;  %v675_v60 = vmax.f32 %v639_v45, 0.0  ;;  %v692_v6 = vmax.f32 %v690_v63, %v677_v59 }
 0x1c5   : > { %v651_v51 = vpop.f32.mrf.mxu1 }
 0x1c6   : > { %v680_v52 = vmax.f32 %v660_v46, 0.0  ;;  %v652_v53 = vadd.f32 %v841_v20, %v651_v51  ;;  %v691_v7 = vmax.f32 %v689_v0, %v675_v60 }
 0x1c7   : > { %v931_v58 = vpop.f32.mrf.mxu1 }
 0x1c8   : > { %v678_v61 = vmax.f32 %v652_v53, 0.0  ;;  %v663_v62 = vadd.f32 %v931_v58, %v841_v20  ;;  %v687_v2 = vmax.f32 %v685_v56, %v680_v52 }
 0x1c9   : > { %v654_v1 = vpop.f32.mrf.mxu1 }
 0x1ca   : > { %v686_v3 = vmax.f32 %v684_v57, %v678_v61  ;;  %v681_v4 = vmax.f32 %v663_v62, 0.0  ;;  %v655_v5 = vadd.f32 %v841_v20, %v654_v1 }
 0x1cc   : > { %v688_v8 = vmax.f32 %v686_v3, %v687_v2  ;;  %v679_v9 = vmax.f32 %v655_v5, 0.0  ;;  %v694_v10 = vmax.f32 %v692_v6, %v681_v4 }
 0x1ce   : > { %700 = vst [vmem:[%s262_s29] sm:$0xff] %v688_v8  ;;  %v693_v11 = vmax.f32 %v691_v7, %v679_v9 }
 0x1d0   : > { %v695_v12 = vmax.f32 %v693_v11, %v694_v10 }
 0x1d2   : > { %701 = vst [vmem:[%s262_s29 + $0x8] sm:$0xff] %v695_v12 }
 0x1d3   : > { %1035 = shalt.err (!%p1032_p5)
}
 0x1d4   : > { %s1036_s16 = scalar_lea.hbm %s1252_s11, 256  ;;  %s1040_s25 = scalar_lea.hbm %s1308_s5, 512 }
 0x1d5   : > { %p1037_p6 = scmp.ne.s32.totalorder %s1252_s11, %s1036_s16  ;;  %p1041_p10 = scmp.lt.s32.totalorder %s1252_s11, %s1308_s5 }
 0x1d6   : > { %p1042_p11 = scmp.lt.s32.totalorder %s1040_s25, %s1036_s16 }
 0x1d7   : > { %p1038_p7 = pnand %p1037_p6, %p1174_p4 }
 0x1d8   : > { %p1043_p12 = por %p1042_p11, %p1041_p10 }
 0x1d9   : > { %p1039_p9 = pneg %p1038_p7 }
 0x1db   : > { %p1044_p13 = pnand %p1043_p12, %p1039_p9 }
 0x1dd   : > { %1047 = shalt.err (!%p1044_p13)
}
 0x1de   : > { %s1102_s8 = smov 128   ;;  %s1103_s9 = smov 8  }
 0x1df   : > { %948 = dma.vmem_to_hbm [thread:$0]  (%p1174_p4), %s1254_s7, 256, %s1252_s11, %s1258_s12, %s1102_s8, %s1102_s8, %s1103_s9  }
 0x1e0 PF: > { %p954_p0 = scmp.ge.s32.totalorder %s1098_s23, 2  ;;  %s743_s10 = sand.u32 1, %s1078_s18  }
 0x1e1   : > { %s744_s13 = scalar_lea.sflag [#allocation3], %s743_s10 }
 0x1e2   : > { %p951_p1 = pnand %p954_p0, %p1181_p8 }
 0x1e4   : > { %p952_p2 = pneg %p951_p1 }
 0x1e6   : > { %1073 = dma.done.wait (%p952_p2), %s744_s13, 256  }
 0x1e7   : > { %1075 = vsyncadd (%p952_p2), %s744_s13, 4294967040  ;;  %s18_s23 = sadd.s32 1, %s1098_s23   ;;  %s1311_s18 = smov %s1082_s19 }
 0x1e8   : > { %p15_p3 = scmp.ge.s32.totalorder %s18_s23, 4   ;;  %s1312_s19 = smov %s1086_s20 }
 0x1e9   : > { %s1313_s20 = smov %s1187_s6  ;;  %s1314_s21 = smov %s1094_s22 }
 0x1ea   : > { %s1315_s22 = smov %s1317_s26  ;;  %17 = sbr.rel (!%p15_p3) target bundleno = 4 (0x4), region = 83 }
 0x1ef   :  { %749 = vsyncpa [#allocation3], 1 }
 0x1f0   :  { %751 = vsyncpa [#allocation3 + $0x1], 1 }

</bundles_post_ra>
